<compile_context>
chip_gen: v5e
topology: v5e:2x2
jax: 0.10.0
libtpu: 0.0.40
codegen_flags: <defaults>
</compile_context>

<pallas_src>
import jax
import jax.numpy as jnp
from jax.experimental import pallas as pl
from jax.experimental.pallas import tpu as pltpu

_LANES = 128


def _neg_log_lik_kernel(tri_ref, strict_ref, risk_ref, e_ref, out_ref, carry_ref):
    # carry_ref: (1, 1) f32 VMEM scratch holding sum(exp(risk)) over all previous tiles.
    @pl.when(pl.program_id(0) == 0)
    def _init():
        carry_ref[...] = jnp.zeros_like(carry_ref)

    risk = risk_ref[...]        # (TR, 128) f32
    e = e_ref[...]              # (TR, 128) f32
    tri = tri_ref[...]          # (128, 128) f32, tri[j, i] = 1 if j <= i
    strict = strict_ref[...]    # (TR, TR)  f32, strict[r, r'] = 1 if r' < r
    tr = risk.shape[0]

    hz = jnp.exp(risk)          # (TR, 128)

    # Inclusive prefix sums within each 128-sample row: one MXU matmul (TR,128)x(128,128).
    within = jnp.dot(hz, tri, preferred_element_type=jnp.float32)        # (TR, 128)

    # Per-row totals (cross-lane reduce) and exclusive prefix across rows (tiny matmul).
    row_tot = jnp.sum(hz, axis=-1, keepdims=True)                        # (TR, 1)
    excl = jnp.dot(strict, row_tot, preferred_element_type=jnp.float32)  # (TR, 1)

    carry = carry_ref[...]                                               # (1, 1)
    csum = within + excl + carry                                         # running cumsum

    log_risk = jnp.log(csum)
    out_ref[...] = -(risk - log_risk) * e

    # Update the running carry with this tile's total hazard sum.
    tile_total = (excl + row_tot)[tr - 1:tr, :]                          # (1, 1)
    carry_ref[...] = carry + tile_total


def neg_log_likelihood_per_sample(prediction, targets, *, block_rows=16):
    """prediction: (N, 1) float; targets: (N,) -> returns (1, N) float32."""
    n = prediction.shape[0]
    tile = block_rows * _LANES
    n_pad = ((n + tile - 1) // tile) * tile
    rows = n_pad // _LANES

    risk = prediction.astype(jnp.float32).reshape(n)
    e = targets.astype(jnp.float32).reshape(n)
    # Pad: risk pad = 0 (exp(0)=1 keeps logs finite), E pad = 0. Padding follows the real
    # samples, so it never contaminates their cumulative sums; padded outputs are sliced off.
    risk_p = jnp.pad(risk, (0, n_pad - n)).reshape(rows, _LANES)
    e_p = jnp.pad(e, (0, n_pad - n)).reshape(rows, _LANES)

    # Constant triangular matrices, built once outside the kernel.
    j = jnp.arange(_LANES)
    tri = (j[:, None] <= j[None, :]).astype(jnp.float32)       # (128, 128)
    r = jnp.arange(block_rows)
    strict = (r[None, :] < r[:, None]).astype(jnp.float32)     # (TR, TR)

    grid = (rows // block_rows,)
    out2d = pl.pallas_call(
        _neg_log_lik_kernel,
        out_shape=jax.ShapeDtypeStruct((rows, _LANES), jnp.float32),
        grid=grid,
        in_specs=[
            pl.BlockSpec((_LANES, _LANES), lambda i: (0, 0)),          # tri (resident)
            pl.BlockSpec((block_rows, block_rows), lambda i: (0, 0)),  # strict (resident)
            pl.BlockSpec((block_rows, _LANES), lambda i: (i, 0)),      # risk tile
            pl.BlockSpec((block_rows, _LANES), lambda i: (i, 0)),      # E tile
        ],
        out_specs=pl.BlockSpec((block_rows, _LANES), lambda i: (i, 0)),
        scratch_shapes=[pltpu.VMEM((1, 1), jnp.float32)],              # running cumsum carry
        compiler_params=pltpu.CompilerParams(
            dimension_semantics=("arbitrary",)),                       # sequential carry
        cost_estimate=pl.CostEstimate(
            flops=2 * n_pad * _LANES,
            transcendentals=2 * n_pad,
            bytes_accessed=12 * n_pad,
        ),
    )(tri, strict, risk_p, e_p)

    return out2d.reshape(1, n_pad)[:, :n]


def _reference(prediction, targets):
    """Pure-JAX reference matching the PyTorch forward exactly."""
    risk = prediction.astype(jnp.float32)                    # (N, 1)
    e = targets.astype(jnp.float32)                          # (N,)
    hazard_ratio = jnp.exp(risk)
    log_risk = jnp.log(jnp.cumsum(hazard_ratio, axis=0))
    uncensored = risk - log_risk
    return -uncensored.T * e                                 # (1, N)


if __name__ == "__main__":
    # Module has no learnable parameters; only inputs are needed.
    key = jax.random.PRNGKey(0)
    k1, k2 = jax.random.split(key)

    # Small shape consistent with the module (N samples, column-vector risk scores).
    N = 8
    prediction = jax.random.normal(k1, (N, 1), dtype=jnp.float32)
    targets = (jax.random.uniform(k2, (N,)) > 0.5).astype(jnp.float32)

    out = jax.block_until_ready(neg_log_likelihood_per_sample(prediction, targets))
    ref = _reference(prediction, targets)
    assert out.shape == ref.shape == (1, N), (out.shape, ref.shape)
    assert jnp.allclose(out, ref, atol=1e-5, rtol=1e-5), (out, ref)

    # Larger check exercising multiple grid steps and the carried running sum.
    k3, k4 = jax.random.split(jax.random.PRNGKey(1))
    N2 = 5000
    pred2 = jax.random.normal(k3, (N2, 1), dtype=jnp.float32)
    tgt2 = (jax.random.uniform(k4, (N2,)) > 0.5).astype(jnp.float32)
    out2 = jax.block_until_ready(neg_log_likelihood_per_sample(pred2, tgt2))
    ref2 = _reference(pred2, tgt2)
    assert out2.shape == ref2.shape == (1, N2)
    assert jnp.allclose(out2, ref2, atol=1e-4, rtol=1e-4)

    print("KERNEL_OK")
</pallas_src>

<mosaic_0001>
module attributes {stable_mosaic.version = 11 : i64} {
  func.func @_neg_log_lik_kernel(%arg0: i32, %arg1: memref<128x128xf32, #tpu.memory_space<vmem>>, %arg2: memref<16x16xf32, #tpu.memory_space<vmem>>, %arg3: memref<16x128xf32, #tpu.memory_space<vmem>>, %arg4: memref<16x128xf32, #tpu.memory_space<vmem>>, %arg5: memref<16x128xf32, #tpu.memory_space<vmem>>, %arg6: memref<1x1xf32, #tpu.memory_space<vmem>>) attributes {dimension_semantics = [#tpu.dimension_semantics<arbitrary>], iteration_bounds = array<i64: 1>, scalar_prefetch = 0 : i64, scratch_operands = 1 : i64, tpu.core_type = #tpu.core_type<tc>, window_params = [{pipeline_mode = #tpu.pipeline_mode<synchronous>, transform_indices = @transform_0, window_bounds = array<i64: 128, 128>}, {pipeline_mode = #tpu.pipeline_mode<synchronous>, transform_indices = @transform_1, window_bounds = array<i64: 16, 16>}, {transform_indices = @transform_2, window_bounds = array<i64: 16, 128>}, {transform_indices = @transform_3, window_bounds = array<i64: 16, 128>}, {transform_indices = @transform_4, window_bounds = array<i64: 16, 128>}]} {
    %c0_i32 = arith.constant 0 : i32
    %0 = arith.cmpi eq, %arg0, %c0_i32 : i32
    %1 = arith.extui %0 : i1 to i32
    %c0_i32_0 = arith.constant 0 : i32
    %2 = arith.cmpi ne, %1, %c0_i32_0 : i32
    scf.if %2 {
      %cst_17 = arith.constant 0.000000e+00 : f32
      %27 = vector.broadcast %cst_17 : f32 to vector<1x1xf32>
      %c0_18 = arith.constant 0 : index
      %c0_19 = arith.constant 0 : index
      %28 = vector.load %arg6[%c0_18, %c0_19] : memref<1x1xf32, #tpu.memory_space<vmem>>, vector<1x1xf32>
      tpu.vector_store %arg6[%c0_18, %c0_19], %27 {strides = array<i32>} : memref<1x1xf32, #tpu.memory_space<vmem>>, vector<1x1xf32>,
    } else {
    }
    %c0 = arith.constant 0 : index
    %c0_1 = arith.constant 0 : index
    %3 = vector.load %arg3[%c0, %c0_1] : memref<16x128xf32, #tpu.memory_space<vmem>>, vector<16x128xf32>
    %c0_2 = arith.constant 0 : index
    %c0_3 = arith.constant 0 : index
    %4 = vector.load %arg4[%c0_2, %c0_3] : memref<16x128xf32, #tpu.memory_space<vmem>>, vector<16x128xf32>
    %c0_4 = arith.constant 0 : index
    %c0_5 = arith.constant 0 : index
    %5 = vector.load %arg1[%c0_4, %c0_5] : memref<128x128xf32, #tpu.memory_space<vmem>>, vector<128x128xf32>
    %c0_6 = arith.constant 0 : index
    %c0_7 = arith.constant 0 : index
    %6 = vector.load %arg2[%c0_6, %c0_7] : memref<16x16xf32, #tpu.memory_space<vmem>>, vector<16x16xf32>
    %7 = math.exp %3 : vector<16x128xf32>
    %cst = arith.constant dense<0.000000e+00> : vector<16x128xf32>
    %8 = tpu.matmul %7, %5, %cst {dimension_numbers = #tpu.dot_dimension_numbers<[1], [0], [0], [1], [0, 0, 1, 1], [], []>} : vector<16x128xf32>, vector<128x128xf32>, vector<16x128xf32> -> vector<16x128xf32>
    %cst_8 = arith.constant dense<0.000000e+00> : vector<16xf32>
    %9 = vector.multi_reduction <add>, %7, %cst_8 [1] : vector<16x128xf32> to vector<16xf32>
    %10 = vector.shape_cast %9 : vector<16xf32> to vector<16x1xf32>
    %cst_9 = arith.constant dense<0.000000e+00> : vector<16x1xf32>
    %11 = tpu.matmul %6, %10, %cst_9 {dimension_numbers = #tpu.dot_dimension_numbers<[1], [0], [0], [1], [0, 0, 1, 1], [], []>} : vector<16x16xf32>, vector<16x1xf32>, vector<16x1xf32> -> vector<16x1xf32>
    %c0_10 = arith.constant 0 : index
    %c0_11 = arith.constant 0 : index
    %12 = vector.load %arg6[%c0_10, %c0_11] : memref<1x1xf32, #tpu.memory_space<vmem>>, vector<1x1xf32>
    %13 = vector.broadcast %11 : vector<16x1xf32> to vector<16x128xf32>
    %14 = arith.addf %8, %13 : vector<16x128xf32>
    %15 = vector.broadcast %12 : vector<1x1xf32> to vector<16x128xf32>
    %16 = arith.addf %14, %15 : vector<16x128xf32>
    %17 = math.log %16 : vector<16x128xf32>
    %18 = arith.subf %3, %17 : vector<16x128xf32>
    %cst_12 = arith.constant 0.000000e+00 : f32
    %19 = vector.broadcast %cst_12 : f32 to vector<16x128xf32>
    %20 = arith.subf %19, %18 : vector<16x128xf32>
    %21 = arith.mulf %20, %4 : vector<16x128xf32>
    %c0_13 = arith.constant 0 : index
    %c0_14 = arith.constant 0 : index
    %22 = vector.load %arg5[%c0_13, %c0_14] : memref<16x128xf32, #tpu.memory_space<vmem>>, vector<16x128xf32>
    tpu.vector_store %arg5[%c0_13, %c0_14], %21 {strides = array<i32>} : memref<16x128xf32, #tpu.memory_space<vmem>>, vector<16x128xf32>,
    %23 = arith.addf %11, %10 : vector<16x1xf32>
    %24 = vector.extract_strided_slice %23 {offsets = [15, 0], sizes = [1, 1], strides = [1, 1]} : vector<16x1xf32> to vector<1x1xf32>
    %25 = arith.addf %12, %24 : vector<1x1xf32>
    %c0_15 = arith.constant 0 : index
    %c0_16 = arith.constant 0 : index
    %26 = vector.load %arg6[%c0_15, %c0_16] : memref<1x1xf32, #tpu.memory_space<vmem>>, vector<1x1xf32>
    tpu.vector_store %arg6[%c0_15, %c0_16], %25 {strides = array<i32>} : memref<1x1xf32, #tpu.memory_space<vmem>>, vector<1x1xf32>,
    return
  }
  func.func @transform_0(%arg0: i32) -> (i32, i32) {
    %c0_i32 = arith.constant 0 : i32
    %c0_i32_0 = arith.constant 0 : i32
    %c0_i32_1 = arith.constant 0 : i32
    return %c0_i32, %c0_i32_0 : i32, i32
  }
  func.func @transform_1(%arg0: i32) -> (i32, i32) {
    %c0_i32 = arith.constant 0 : i32
    %c0_i32_0 = arith.constant 0 : i32
    %c0_i32_1 = arith.constant 0 : i32
    return %c0_i32, %c0_i32_0 : i32, i32
  }
  func.func @transform_2(%arg0: i32) -> (i32, i32) {
    %c0_i32 = arith.constant 0 : i32
    %c0_i32_0 = arith.constant 0 : i32
    return %arg0, %c0_i32 : i32, i32
  }
  func.func @transform_3(%arg0: i32) -> (i32, i32) {
    %c0_i32 = arith.constant 0 : i32
    %c0_i32_0 = arith.constant 0 : i32
    return %arg0, %c0_i32 : i32, i32
  }
  func.func @transform_4(%arg0: i32) -> (i32, i32) {
    %c0_i32 = arith.constant 0 : i32
    %c0_i32_0 = arith.constant 0 : i32
    return %arg0, %c0_i32 : i32, i32
  }
}

</mosaic_0001>

<bundles_post_ra>
// kernel: tpu_custom_call.1
= control target key start
LH: loop header
LB: loop body
LE: loop exit
PB: predicated region body
PF: predicated region fallthrough
CT: control target
= control target key end

     0   :  { %9 = vsyncpa [#allocation4], 0  ;;  %s476_s0 = inlined_call_operand.hbm [shape: f32[128,128], index: 0, kind: input, shape index: {}]   ;;  %s477_s1 = inlined_call_operand.hbm [shape: f32[16,16], index: 1, kind: input, shape index: {}]   ;;  %s478_s2 = inlined_call_operand.hbm [shape: f32[16,128], index: 2, kind: input, shape index: {}]   ;;  %s479_s3 = inlined_call_operand.hbm [shape: f32[16,128], index: 3, kind: input, shape index: {}]   ;;  %s480_s4 = inlined_call_operand.hbm [shape: f32[16,128], index: 4, kind: output, shape index: {}]  }
   0x1   :  { %10 = vsyncpa [#allocation7], 0 }
   0x2   :  { %11 = vsyncpa [#allocation10], 0 }
   0x3   :  { %12 = vsyncpa [#allocation5], 0  ;;  %s30_s17 = sshll.u32 %s477_s1, 4  ;;  %s398_s18 = smov [#allocation6]   ;;  %s31_s17 = int_to_ptr.hbm [resolvable:$true] %s30_s17 }
   0x4   :  { %s32_s19 = sshll.u32 %s398_s18, 4  ;;  %s17_s22 = sshll.u32 %s476_s0, 4  ;;  %s33_s19 = int_to_ptr.vmem [resolvable:$true] %s32_s19  ;;  %s18_s22 = int_to_ptr.hbm [resolvable:$true] %s17_s22 }
   0x5   :  { %s399_s23 = smov 128   ;;  %s400_s24 = smov 8  }
   0x6   :  { %38 = dma.hbm_to_vmem [thread:$0]  %s31_s17, 256, %s33_s19, [#allocation7], %s399_s23, %s399_s23, %s400_s24  }
   0x7   :  { %s401_s25 = smov [#allocation3]   ;;  %s43_s1 = sshll.u32 %s478_s2, 4  ;;  %s44_s1 = int_to_ptr.hbm [resolvable:$true] %s43_s1 }
   0x8   :  { %s19_s26 = sshll.u32 %s401_s25, 4  ;;  %s56_s30 = sshll.u32 %s479_s3, 4  ;;  %s20_s26 = int_to_ptr.vmem [resolvable:$true] %s19_s26  ;;  %s57_s30 = int_to_ptr.hbm [resolvable:$true] %s56_s30 }
   0x9   :  { %25 = dma.hbm_to_vmem [thread:$0]  %s18_s22, 2048, %s20_s26, [#allocation4], %s399_s23, %s399_s23, %s400_s24  }
   0xa   :  { %s402_s5 = smov [#allocation8]   ;;  %s403_s7 = smov [#allocation9]  }
   0xb   :  { %s45_s6 = sshll.u32 %s402_s5, 4  ;;  %s58_s2 = sshll.u32 %s403_s7, 4  ;;  %s46_s6 = int_to_ptr.vmem [resolvable:$true] %s45_s6  ;;  %s59_s2 = int_to_ptr.vmem [resolvable:$true] %s58_s2 }
   0xc   :  { %51 = dma.hbm_to_vmem [thread:$0]  %s44_s1, 256, %s46_s6, [#allocation7], %s399_s23, %s399_s23, %s400_s24  }
   0xd   :  { %64 = dma.hbm_to_vmem [thread:$0]  %s57_s30, 256, %s59_s2, [#allocation10], %s399_s23, %s399_s23, %s400_s24  }
   0xe   :  { %390 = dma.done.wait [#allocation4], 2048  }
   0xf   :  { %391 = vsyncadd [#allocation4], 4294965248 }
  0x10   :  { %392 = dma.done.wait [#allocation7], 512  }
  0x11   :  { %393 = vsyncadd [#allocation7], 4294966784 }
  0x12   :  { %394 = dma.done.wait [#allocation10], 256  }
  0x13   :  { %395 = vsyncadd [#allocation10], 4294967040  ;;  %v456_v0 = vld [vmem:[#allocation8 + $0x8] sm:$0xff]  ;;  %v459_v2 = vld [vmem:[#allocation8] sm:$0xff]  ;;  %v404_v10 = vmov 0   ;;  %vm117_vm0 = vcmask 130048  }
  0x14   :  { %v111_v1 = vmul.f32 1.442695, %v456_v0  ;;  %v109_v3 = vmul.f32 1.442695, %v459_v2  ;;  %v106_v6 = vld [vmem:[#allocation3 + $0x78] sm:$0xff]  ;;  %v105_v7 = vld [vmem:[#allocation3 + $0x70] sm:$0xff]  ;;  %258 = vset.pattern.permute.xlu1 %v404_v10  ;;  %259 = vset.pattern.permute.xlu2 %v404_v10 }
  0x15   :  { %158 = vmatpush.msra.mxu1 %v106_v6  ;;  %233 = vmatpush.msra.mxu2 %v106_v6  ;;  %v104_v8 = vld [vmem:[#allocation3 + $0x68] sm:$0xff]  ;;  %v103_v9 = vld [vmem:[#allocation3 + $0x60] sm:$0xff]  ;;  %v102_v11 = vld [vmem:[#allocation3 + $0x58] sm:$0xff]  ;;  %vm85_vm1 = vcmask 0   ;;  %v405_v27 = vmov 0.0   ;;  %s406_s3 = smov [#allocation11]  }
  0x16   :  { %262 = vpow2.f32 %v111_v1  ;;  %260 = vset.pattern.permute.xlu0 %v404_v10  ;;  %v101_v12 = vld [vmem:[#allocation3 + $0x50] sm:$0xff]  ;;  %v100_v13 = vld [vmem:[#allocation3 + $0x48] sm:$0xff]  ;;  %v99_v14 = vld [vmem:[#allocation3 + $0x40] sm:$0xff]  ;;  %86 = vst.msk [vmem:[#allocation2] sm:$0x1] %vm85_vm1, %v405_v27  ;;  %s214_s8 = sshll.u32 %s406_s3, 4  ;;  %s215_s8 = int_to_ptr.vmem [resolvable:$true] %s214_s8 }
  0x17   :  { %264 = vpow2.f32 %v109_v3  ;;  %159 = vmatpush.msra.mxu1 %v105_v7  ;;  %234 = vmatpush.msra.mxu2 %v105_v7  ;;  %v98_v16 = vld [vmem:[#allocation3 + $0x38] sm:$0xff]  ;;  %v97_v17 = vld [vmem:[#allocation3 + $0x30] sm:$0xff]  ;;  %v96_v18 = vld [vmem:[#allocation3 + $0x28] sm:$0xff]  ;;  %s216_s11 = sshll.u32 %s480_s4, 4  ;;  %s217_s11 = int_to_ptr.hbm [resolvable:$true] %s216_s11 }
  0x18   :  { %v95_v19 = vld [vmem:[#allocation3 + $0x20] sm:$0xff]  ;;  %v94_v22 = vld [vmem:[#allocation3 + $0x18] sm:$0xff]  ;;  %v93_v23 = vld [vmem:[#allocation3 + $0x10] sm:$0xff] }
  0x19   :  { %160 = vmatpush.msra.mxu1 %v104_v8  ;;  %235 = vmatpush.msra.mxu2 %v104_v8  ;;  %v107_v20 = vld [vmem:[#allocation6] sm:$0xff]  ;;  %v92_v24 = vld [vmem:[#allocation3 + $0x8] sm:$0xff] }
  0x1a   :  { %v91_v25 = vld [vmem:[#allocation3] sm:$0xff]  ;;  %v108_v26 = vld [vmem:[#allocation6 + $0x8] sm:$0xff] }
  0x1b   :  { %161 = vmatpush.msra.mxu1 %v103_v9  ;;  %236 = vmatpush.msra.mxu2 %v103_v9  ;;  %v89_v47 = vld [vmem:[#allocation9] sm:$0xff]  ;;  %v90_v53 = vld [vmem:[#allocation9 + $0x8] sm:$0xff] }
  0x1c   :  { %v462_v4 = vpop.eup %262 }
  0x1d   :  { %115 = vadd.xlane.f32.xlu0 %v462_v4  ;;  %v265_v5 = vpop.eup %264  ;;  %162 = vmatpush.msra.mxu1 %v102_v11  ;;  %v261_v28 = vld [vmem:[#allocation2] ss:$0 sm:$0xff] }
  0x1e   :  { %237 = vmatpush.msra.mxu2 %v102_v11  ;;  %184 = vperm.xlu2 %259, %v261_v28   ;;  %v147_v32 = vld [vmem:[#allocation2] sm:$0x1] }
  0x1f   :  { %163 = vmatpush.msra.mxu1 %v101_v12 }
  0x20   :  { %238 = vmatpush.msra.mxu2 %v101_v12 }
  0x21   :  { %164 = vmatpush.msra.mxu1 %v100_v13 }
  0x22   :  { %239 = vmatpush.msra.mxu2 %v100_v13 }
  0x23   :  { %165 = vmatpush.msra.mxu1 %v99_v14 }
  0x24   :  { %240 = vmatpush.msra.mxu2 %v99_v14 }
  0x25   :  { %113 = vadd.xlane.f32.xlu0 %v265_v5  ;;  %166 = vmatpush.msra.mxu1 %v98_v16 }
  0x26   :  { %241 = vmatpush.msra.mxu2 %v98_v16 }
  0x27   :  { %167 = vmatpush.msra.mxu1 %v97_v17 }
  0x28   :  { %242 = vmatpush.msra.mxu2 %v97_v17 }
  0x29   :  { %168 = vmatpush.msra.mxu1 %v96_v18 }
  0x2a   :  { %243 = vmatpush.msra.mxu2 %v96_v18 }
  0x2b   :  { %169 = vmatpush.msra.mxu1 %v95_v19 }
  0x2c   :  { %244 = vmatpush.msra.mxu2 %v95_v19 }
  0x2d   :  { %170 = vmatpush.msra.mxu1 %v94_v22 }
  0x2e   :  { %245 = vmatpush.msra.mxu2 %v94_v22 }
  0x2f   :  { %171 = vmatpush.msra.mxu1 %v93_v23 }
  0x30   :  { %246 = vmatpush.msra.mxu2 %v93_v23 }
  0x31   :  { %172 = vmatpush.msra.mxu1 %v92_v24 }
  0x32   :  { %247 = vmatpush.msra.mxu2 %v92_v24 }
  0x33   :  { %173 = vmatpush.msra.mxu1 %v91_v25 }
  0x34   :  { %174 = vmatmul.f32.vlgmr.msra.gmra.mxu1 %v265_v5  ;;  %248 = vmatpush.msra.mxu2 %v91_v25 }
  0x35   :  { %177 = vmatmul.f32.vlgmr.msra.gmra.mxu2 %v462_v4 }
  0x78   :  { %v185_v37 = vpop.permute.xlu2 %184 }
  0x90   :  { %v116_v15 = vpop.xlane.xlu0 %115 }
  0x91   :  { %138 = vmatpush.msra.mxu0 %v116_v15 }
  0x98   :  { %v114_v21 = vpop.xlane.xlu0 %113 }
  0x99   :  { %139 = vmatpush.msra.mxu0 %v114_v21 }
  0x9a   :  { %231 = vmatmul.msk.f32.vlgmr.msra.gmra.mxu0 %vm117_vm0, %v107_v20 }
  0xa2   :  { %232 = vmatmul.msk.f32.gmra.mxu0 %vm117_vm0, %v108_v26 }
  0xb1   :  { %v175_v35 = vpop.f32.mrf.mxu1 }
  0xb8   :  { %v178_v40 = vpop.f32.mrf.mxu2 }
 0x117   :  { %v141_v29 = vpop.f32.mrf.mxu0 }
 0x118   :  { %150 = vperm.xlu1 %258, %v141_v29  }
 0x11f   :  { %v144_v30 = vpop.f32.mrf.mxu0 }
 0x120   :  { %v201_v31 = vadd.f32 %v144_v30, %v116_v15  ;;  %155 = vperm.xlu1 %258, %v144_v30  }
 0x122   :  { %203 = vst [vmem:[#allocation1] sm:$0xff] %v201_v31 }
 0x129   :  { %v205_v33 = vld [vmem:[#allocation1 + $0x7] ss:$9 sm:$0xff] }
 0x12a   :  { %v207_v34 = vadd.f32 %v205_v33, %v147_v32 }
 0x12c   :  { %209 = vst.msk [vmem:[#allocation2] sm:$0x1] %vm85_vm1, %v207_v34 }
 0x18a   :  { %v151_v36 = vpop.permute.xlu1 %150 }
 0x18b   :  { %v176_v38 = vadd.f32 %v175_v35, %v151_v36 }
 0x18d   :  { %v187_v39 = vadd.f32 %v185_v37, %v176_v38 }
 0x18f   :  { %266 = vlog2.f32 %v187_v39 }
 0x192   :  { %v156_v41 = vpop.permute.xlu1 %155 }
 0x193   :  { %v179_v42 = vadd.f32 %v178_v40, %v156_v41 }
 0x195   :  { %v267_v43 = vpop.eup %266  ;;  %v188_v44 = vadd.f32 %v185_v37, %v179_v42 }
 0x196   :  { %v190_v45 = vmul.f32 0.6931472, %v267_v43 }
 0x197   :  { %268 = vlog2.f32 %v188_v44 }
 0x198   :  { %v193_v46 = vsub.f32 %v459_v2, %v190_v45 }
 0x19a   :  { %v195_v48 = vsub.f32 0.0, %v193_v46 }
 0x19c   :  { %v197_v49 = vmul.f32 %v195_v48, %v89_v47 }
 0x19d   :  { %v269_v50 = vpop.eup %268 }
 0x19e   :  { %199 = vst [vmem:[#allocation11] sm:$0xff] %v197_v49  ;;  %v192_v51 = vmul.f32 0.6931472, %v269_v50 }
 0x1a0   :  { %v194_v52 = vsub.f32 %v456_v0, %v192_v51 }
 0x1a2   :  { %v196_v54 = vsub.f32 0.0, %v194_v52 }
 0x1a4   :  { %v198_v55 = vmul.f32 %v196_v54, %v90_v53 }
 0x1a6   :  { %200 = vst [vmem:[#allocation11 + $0x8] sm:$0xff] %v198_v55 }
 0x1a7   :  { %222 = dma.vmem_to_hbm [thread:$0]  %s215_s8, 256, %s217_s11, [#allocation5], %s399_s23, %s399_s23, %s400_s24  }
 0x1a8   :  { %396 = dma.done.wait [#allocation5], 256  }
 0x1a9   :  { %397 = vsyncadd [#allocation5], 4294967040 }
 0x1aa   :  { %227 = vsyncpa [#allocation4], 1 }
 0x1ab   :  { %228 = vsyncpa [#allocation7], 1 }
 0x1ac   :  { %229 = vsyncpa [#allocation10], 1 }
 0x1ad   :  { %230 = vsyncpa [#allocation5], 1 }

</bundles_post_ra>
